<compile_context>
chip_gen: v5e
topology: v5e:2x2
jax: 0.10.0
libtpu: 0.0.40
codegen_flags: <defaults>
</compile_context>

<pallas_src>
import numpy as np
import jax
import jax.numpy as jnp
from jax.experimental import pallas as pl
from jax.experimental.pallas import tpu as pltpu

_LANE = 128


def _make_kernel(m, b):
    """m[ci][co] and b[co] are Python floats baked into the kernel as immediates."""
    def kernel(img_ref, out_ref):
        # img_ref / out_ref: (1, 3, TR, 128) VMEM blocks; each channel slice is a
        # dense (TR, 128) slab -> fully packed vregs on the VPU.
        xs = (img_ref[0, 0], img_ref[0, 1], img_ref[0, 2])
        for co in range(3):
            terms = []
            for ci in range(3):
                c = m[ci][co]
                if c == 0.0:
                    continue
                terms.append(xs[ci] if c == 1.0 else c * xs[ci])
            acc = terms[0]
            for t in terms[1:]:
                acc = acc + t
            if b[co] != 0.0:
                acc = acc + b[co]
            out_ref[0, co] = acc          # direct dense per-channel store
    return kernel


def ycbcr_to_rgb_jpeg(image, matrix, shift, *, tile_rows=512):
    """image: (B, 3, H, W) float NCHW -> (B, 3, H, W) float32 NCHW."""
    B, C, H, W = image.shape
    assert C == 3
    HW = H * W

    # Fold *255, +shift, /255 into the 3x3 mix (host-side, constants only):
    #   out = ((x*255 + shift) @ M) / 255 = x @ M + (shift @ M) / 255
    m_np = np.asarray(jax.device_get(matrix), dtype=np.float32)
    s_np = np.asarray(jax.device_get(shift), dtype=np.float32)
    b_np = (s_np @ m_np) / np.float32(255.0)
    m_const = tuple(tuple(float(m_np[ci, co]) for co in range(3)) for ci in range(3))
    b_const = tuple(float(v) for v in b_np)

    # Lay the spatial axis out as (rows, 128) lane-dense slabs per channel.
    rows = -(-HW // _LANE)                       # ceil(HW / 128)
    if rows >= tile_rows:
        TR = tile_rows                           # multiple of 8; ~0.8 MiB/block -> fits v5e/v6e/v7x VMEM
    else:
        TR = -(-rows // 8) * 8                   # small images: one multiple-of-8 tile
    rows_p = -(-rows // TR) * TR                 # pad rows to a multiple of TR
    HW_p = rows_p * _LANE

    x = image.astype(jnp.float32).reshape(B, C, HW)
    if HW_p != HW:
        x = jnp.pad(x, ((0, 0), (0, 0), (0, HW_p - HW)))
    x = x.reshape(B, C, rows_p, _LANE)
    n_tiles = rows_p // TR

    out = pl.pallas_call(
        _make_kernel(m_const, b_const),
        out_shape=jax.ShapeDtypeStruct((B, C, rows_p, _LANE), jnp.float32),
        grid_spec=pltpu.PrefetchScalarGridSpec(
            num_scalar_prefetch=0,
            grid=(B, n_tiles),
            in_specs=[pl.BlockSpec((1, C, TR, _LANE), lambda bi, ti: (bi, 0, ti, 0))],
            out_specs=pl.BlockSpec((1, C, TR, _LANE), lambda bi, ti: (bi, 0, ti, 0)),
        ),
        compiler_params=pltpu.CompilerParams(
            dimension_semantics=("parallel", "parallel")),
    )(x)

    out = out.reshape(B, C, HW_p)[:, :, :HW]     # drop spatial padding
    return out.reshape(B, C, H, W)


def _reference(image, matrix, shift):
    # pure-JAX reference mirroring the PyTorch forward
    img = image * 255.0
    img = jnp.transpose(img, (0, 2, 3, 1))             # B,H,W,3
    res = jnp.tensordot(img + shift, matrix, axes=1)   # B,H,W,3
    res = res / 255.0
    return jnp.transpose(res, (0, 3, 1, 2))            # B,3,H,W


if __name__ == "__main__":
    # deterministic parameter init, exactly as in the module's __init__
    matrix_np = np.array([[1.0, 0.0, 1.402],
                          [1.0, -0.344136, -0.714136],
                          [1.0, 1.772, 0.0]], dtype=np.float32).T
    matrix = jnp.asarray(matrix_np)                      # (3, 3), [c_in, c_out]
    shift = jnp.asarray([0.0, -128.0, -128.0], dtype=jnp.float32)

    key = jax.random.PRNGKey(0)
    B, C, H, W = 2, 3, 16, 16
    image = jax.random.uniform(key, (B, C, H, W), dtype=jnp.float32)

    out = jax.block_until_ready(ycbcr_to_rgb_jpeg(image, matrix, shift))
    ref = _reference(image, matrix, shift)
    assert out.shape == (B, C, H, W)
    assert jnp.allclose(out, ref, atol=1e-4, rtol=1e-4)

    # second check: non-multiple-of-128 spatial size exercising padding + multi-tile grid
    image2 = jax.random.uniform(jax.random.PRNGKey(1), (1, 3, 40, 56), dtype=jnp.float32)
    out2 = jax.block_until_ready(ycbcr_to_rgb_jpeg(image2, matrix, shift, tile_rows=8))
    ref2 = _reference(image2, matrix, shift)
    assert jnp.allclose(out2, ref2, atol=1e-4, rtol=1e-4)

    print("KERNEL_OK")
</pallas_src>

<mosaic_0001>
module attributes {stable_mosaic.version = 11 : i64} {
  func.func @kernel(%arg0: i32, %arg1: i32, %arg2: memref<1x3x8x128xf32, #tpu.memory_space<vmem>>, %arg3: memref<1x3x8x128xf32, #tpu.memory_space<vmem>>) attributes {dimension_semantics = [#tpu.dimension_semantics<parallel>, #tpu.dimension_semantics<parallel>], iteration_bounds = array<i64: 2, 1>, scalar_prefetch = 0 : i64, scratch_operands = 0 : i64, tpu.core_type = #tpu.core_type<tc>, window_params = [{transform_indices = @transform_0, window_bounds = array<i64: 1, 3, 8, 128>}, {transform_indices = @transform_1, window_bounds = array<i64: 1, 3, 8, 128>}]} {
    %c0 = arith.constant 0 : index
    %c0_0 = arith.constant 0 : index
    %c0_1 = arith.constant 0 : index
    %c0_2 = arith.constant 0 : index
    %0 = vector.load %arg2[%c0, %c0_0, %c0_1, %c0_2] : memref<1x3x8x128xf32, #tpu.memory_space<vmem>>, vector<1x1x8x128xf32>
    %1 = vector.shape_cast %0 : vector<1x1x8x128xf32> to vector<8x128xf32>
    %c0_3 = arith.constant 0 : index
    %c1 = arith.constant 1 : index
    %c0_4 = arith.constant 0 : index
    %c0_5 = arith.constant 0 : index
    %2 = vector.load %arg2[%c0_3, %c1, %c0_4, %c0_5] : memref<1x3x8x128xf32, #tpu.memory_space<vmem>>, vector<1x1x8x128xf32>
    %3 = vector.shape_cast %2 : vector<1x1x8x128xf32> to vector<8x128xf32>
    %c0_6 = arith.constant 0 : index
    %c2 = arith.constant 2 : index
    %c0_7 = arith.constant 0 : index
    %c0_8 = arith.constant 0 : index
    %4 = vector.load %arg2[%c0_6, %c2, %c0_7, %c0_8] : memref<1x3x8x128xf32, #tpu.memory_space<vmem>>, vector<1x1x8x128xf32>
    %5 = vector.shape_cast %4 : vector<1x1x8x128xf32> to vector<8x128xf32>
    %cst = arith.constant 1.402000e+00 : f32
    %6 = vector.broadcast %cst : f32 to vector<8x128xf32>
    %7 = arith.mulf %6, %5 : vector<8x128xf32>
    %8 = arith.addf %1, %7 : vector<8x128xf32>
    %cst_9 = arith.constant -7.037490e-01 : f32
    %9 = vector.broadcast %cst_9 : f32 to vector<8x128xf32>
    %10 = arith.addf %8, %9 : vector<8x128xf32>
    %c0_10 = arith.constant 0 : index
    %c0_11 = arith.constant 0 : index
    %c0_12 = arith.constant 0 : index
    %c0_13 = arith.constant 0 : index
    %11 = vector.load %arg3[%c0_10, %c0_11, %c0_12, %c0_13] : memref<1x3x8x128xf32, #tpu.memory_space<vmem>>, vector<1x1x8x128xf32>
    %12 = vector.shape_cast %11 : vector<1x1x8x128xf32> to vector<8x128xf32>
    %13 = vector.shape_cast %10 : vector<8x128xf32> to vector<1x1x8x128xf32>
    tpu.vector_store %arg3[%c0_10, %c0_11, %c0_12, %c0_13], %13 {strides = array<i32>} : memref<1x3x8x128xf32, #tpu.memory_space<vmem>>, vector<1x1x8x128xf32>,
    %cst_14 = arith.constant -3.441360e-01 : f32
    %14 = vector.broadcast %cst_14 : f32 to vector<8x128xf32>
    %15 = arith.mulf %14, %3 : vector<8x128xf32>
    %cst_15 = arith.constant -7.141360e-01 : f32
    %16 = vector.broadcast %cst_15 : f32 to vector<8x128xf32>
    %17 = arith.mulf %16, %5 : vector<8x128xf32>
    %18 = arith.addf %1, %15 : vector<8x128xf32>
    %19 = arith.addf %18, %17 : vector<8x128xf32>
    %cst_16 = arith.constant 5.312110e-01 : f32
    %20 = vector.broadcast %cst_16 : f32 to vector<8x128xf32>
    %21 = arith.addf %19, %20 : vector<8x128xf32>
    %c0_17 = arith.constant 0 : index
    %c1_18 = arith.constant 1 : index
    %c0_19 = arith.constant 0 : index
    %c0_20 = arith.constant 0 : index
    %22 = vector.load %arg3[%c0_17, %c1_18, %c0_19, %c0_20] : memref<1x3x8x128xf32, #tpu.memory_space<vmem>>, vector<1x1x8x128xf32>
    %23 = vector.shape_cast %22 : vector<1x1x8x128xf32> to vector<8x128xf32>
    %24 = vector.shape_cast %21 : vector<8x128xf32> to vector<1x1x8x128xf32>
    tpu.vector_store %arg3[%c0_17, %c1_18, %c0_19, %c0_20], %24 {strides = array<i32>} : memref<1x3x8x128xf32, #tpu.memory_space<vmem>>, vector<1x1x8x128xf32>,
    %cst_21 = arith.constant 1.772000e+00 : f32
    %25 = vector.broadcast %cst_21 : f32 to vector<8x128xf32>
    %26 = arith.mulf %25, %3 : vector<8x128xf32>
    %27 = arith.addf %1, %26 : vector<8x128xf32>
    %cst_22 = arith.constant -0.889474511 : f32
    %28 = vector.broadcast %cst_22 : f32 to vector<8x128xf32>
    %29 = arith.addf %27, %28 : vector<8x128xf32>
    %c0_23 = arith.constant 0 : index
    %c2_24 = arith.constant 2 : index
    %c0_25 = arith.constant 0 : index
    %c0_26 = arith.constant 0 : index
    %30 = vector.load %arg3[%c0_23, %c2_24, %c0_25, %c0_26] : memref<1x3x8x128xf32, #tpu.memory_space<vmem>>, vector<1x1x8x128xf32>
    %31 = vector.shape_cast %30 : vector<1x1x8x128xf32> to vector<8x128xf32>
    %32 = vector.shape_cast %29 : vector<8x128xf32> to vector<1x1x8x128xf32>
    tpu.vector_store %arg3[%c0_23, %c2_24, %c0_25, %c0_26], %32 {strides = array<i32>} : memref<1x3x8x128xf32, #tpu.memory_space<vmem>>, vector<1x1x8x128xf32>,
    return
  }
  func.func @transform_0(%arg0: i32, %arg1: i32) -> (i32, i32, i32, i32) {
    %c0_i32 = arith.constant 0 : i32
    %c0_i32_0 = arith.constant 0 : i32
    %c0_i32_1 = arith.constant 0 : i32
    return %arg0, %c0_i32, %arg1, %c0_i32_0 : i32, i32, i32, i32
  }
  func.func @transform_1(%arg0: i32, %arg1: i32) -> (i32, i32, i32, i32) {
    %c0_i32 = arith.constant 0 : i32
    %c0_i32_0 = arith.constant 0 : i32
    %c0_i32_1 = arith.constant 0 : i32
    return %arg0, %c0_i32, %arg1, %c0_i32_0 : i32, i32, i32, i32
  }
}

</mosaic_0001>

<bundles_post_ra>
// kernel: tpu_custom_call.1
= control target key start
LH: loop header
LB: loop body
LE: loop exit
PB: predicated region body
PF: predicated region fallthrough
CT: control target
= control target key end

     0   :  { %6 = vsyncpa [#allocation3], 0  ;;  %s608_s0 = inlined_call_operand.hbm [shape: f32[2,3,8,128], index: 0, kind: input, shape index: {}]   ;;  %s609_s1 = inlined_call_operand.hbm [shape: f32[2,3,8,128], index: 1, kind: output, shape index: {}]  }
   0x1   :  { %8 = vsyncpa [#allocation3 + $0x1], 0 }
   0x2   :  { %9 = vsyncpa [#allocation4], 0 }
   0x3   :  { %11 = vsyncpa [#allocation4 + $0x1], 0  ;;  %s488_s6 = smov 0   ;;  %s490_s7 = smov 0  }
   0x4   :  { %s492_s8 = smov 0   ;;  %s494_s9 = smov 0  }
   0x5   :  { %s496_s10 = smov 0   ;;  %s498_s11 = smov 0  }
   0x6 LB: > { %s277_s12 = sadd.s32 4294967295, %s472_s11   ;;  %s278_s13 = sadd.s32 4294967294, %s472_s11   ;;  %s472_s11 = sphi %s498_s11, %s17_s11   ;;  %s468_s10 = sphi %s496_s10, %s618_s10   ;;  %s464_s9 = sphi %s494_s9, %s617_s9   ;;  %s460_s8 = sphi %s492_s8, %s616_s8   ;;  %s456_s7 = sphi %s490_s7, %s615_s7   ;;  %s452_s6 = sphi %s488_s6, %s614_s6  }
   0x7   : > { %s29_s14 = sadd.s32 1, %s468_s10  ;;  %s38_s15 = sadd.s32 1, %s460_s8 }
   0x8   : > { %p31_p0 = scmp.ge.s32.totalorder %s29_s14, 2  ;;  %p45_p1 = scmp.ne.s32.totalorder %s460_s8, %s456_s7 }
   0x9   : > { %p46_p2 = scmp.eq.s32.totalorder %s472_s11, 0  ;;  %p51_p3 = scmp.ne.s32.totalorder %s456_s7, %s452_s6 }
   0xa   : > { %s620_s14 = smov (%p31_p0, %s29_s14), 0  ;;  %p52_p5 = scmp.eq.s32.totalorder %s277_s12, 0 }
   0xb   : > { %p529_p4 = por %p46_p2, %p45_p1  ;;  %s33_s17 = ssub.s32 %s468_s10, %s620_s14 }
   0xc   : > { %p77_p6 = scmp.eq.s32.totalorder %s277_s12, 1  ;;  %p36_p7 = scmp.eq.s32.totalorder %s33_s17, 0 }
   0xd   : > { %p535_p8 = por %p52_p5, %p51_p3  ;;  %p83_p10 = scmp.eq.s32.totalorder %s278_s13, 1 }
   0xe   : > { %p539_p9 = por %p77_p6, %p45_p1  ;;  %p280_p12 = scmp.ge.s32.totalorder %s472_s11, 2 }
   0xf   : > { %s544_s20 = scalar_select %p36_p7, %s460_s8, %s38_s15  }
  0x10   : > { %p546_p11 = por %p83_p10, %p51_p3  ;;  %p306_p13 = scmp.lt.s32.totalorder %s472_s11, 2 }
  0x11   : > { %s103_s22 = sand.u32 1, %s460_s8   ;;  %s291_s24 = smul.u32 24, %s468_s10 }
  0x12   : > { %s290_s23 = smul.u32 24, %s103_s22  ;;  %p299_p0 = pnand %p306_p13, %p529_p4 }
  0x13   : > { %s113_s27 = scalar_lea.hbm %s608_s0, %s291_s24  ;;  %p282_p1 = scmp.ge.s32.totalorder %s472_s11, 1 }
  0x14   : > { %s107_s28 = scalar_lea.vmem [#allocation2], %s290_s23  ;;  %s114_s30 = sshll.u32 %s113_s27, 4  ;;  %s115_s30 = int_to_ptr.hbm [resolvable:$true] %s114_s30 }
  0x15   : > { %s116_s29 = sshll.u32 %s107_s28, 4  ;;  %s104_s2 = scalar_lea.sflag [#allocation3], %s103_s22  ;;  %s117_s29 = int_to_ptr.vmem [resolvable:$true] %s116_s29 }
  0x16   : > { %s474_s3 = smov 128   ;;  %s475_s4 = smov 8  }
  0x17   : > { %301 = dma.hbm_to_vmem [thread:$0]  (!%p299_p0), %s115_s30, 384, %s117_s29, %s104_s2, %s474_s3, %s474_s3, %s475_s4  }
  0x18   : > { %p124_p2 = scmp.lt.s32.totalorder %s472_s11, 3 }
  0x1a   : > { %p125_p3 = pnand %p282_p1, %p124_p2 }
  0x1b   : > { %s562_s5 = sand.u32 (!%p125_p3), 1, %s456_s7  }
  0x1c   : > { %128 = sbr.rel (%p125_p3) target bundleno = 51 (0x33), region = 24  ;;  %s131_s13 = scalar_lea.sflag (!%p125_p3), [#allocation3], %s562_s5 }
  0x1d   : > { %s292_s12 = smul.u32 (!%p125_p3), 24, %s562_s5 }
  0x1f   : > { %s134_s15 = scalar_lea.vmem (!%p125_p3), [#allocation2], %s292_s12 }
  0x21   : > { %443 = dma.done.wait (%p535_p8), %s131_s13, 384  }
  0x22   : > { %445 = vsyncadd (%p535_p8), %s131_s13, 4294966912  ;;  %s293_s16 = smul.u32 24, %s464_s9  ;;  %v154_v0 = vld [vmem:[%s134_s15] sm:$0xff]  ;;  %v284_v1 = vld [vmem:[%s134_s15 + $0x10] sm:$0xff]  ;;  %s153_s24 = scalar_lea.vmem [#allocation5], %s292_s12 }
  0x23   : > { %v283_v2 = vld [vmem:[%s134_s15 + $0x8] sm:$0xff]  ;;  %v159_v3 = vmul.f32 1.402, %v284_v1  ;;  %v164_v5 = vmul.f32 -0.714136, %v284_v1  ;;  %s189_s25 = sshll.u32 %s153_s24, 4  ;;  %s190_s25 = int_to_ptr.vmem [resolvable:$true] %s189_s25 }
  0x24   : > { %v163_v4 = vmul.f32 -0.344136, %v283_v2  ;;  %s188_s23 = scalar_lea.hbm %s609_s1, %s293_s16  ;;  %v170_v6 = vmul.f32 1.772, %v283_v2  ;;  %s176_s9 = scalar_lea.sflag [#allocation4], %s562_s5 }
  0x25   : > { %v160_v7 = vadd.f32 %v159_v3, %v154_v0  ;;  %s191_s18 = sshll.u32 %s188_s23, 4  ;;  %s410_s30 = scalar_lea.hbm %s609_s1, 48  ;;  %s192_s18 = int_to_ptr.hbm [resolvable:$true] %s191_s18 }
  0x26   : > { %v165_v8 = vadd.f32 %v163_v4, %v154_v0  ;;  %v171_v9 = vadd.f32 %v170_v6, %v154_v0  ;;  %s404_s26 = sshra.s32 %s192_s18, 4  ;;  %s405_s26 = int_to_ptr.hbm [resolvable:$true] %s404_s26 }
  0x27   : > { %v161_v10 = vadd.f32 -0.703749, %v160_v7  ;;  %s406_s27 = scalar_lea.hbm %s405_s26, 24  ;;  %p411_p7 = scmp.lt.s32.totalorder %s405_s26, %s609_s1 }
  0x28   : > { %v166_v11 = vadd.f32 %v165_v8, %v164_v5  ;;  %v172_v12 = vadd.f32 -0.8894745, %v171_v9  ;;  %p407_p4 = scmp.ne.s32.totalorder %s405_s26, %s406_s27  ;;  %p412_p8 = scmp.lt.s32.totalorder %s410_s30, %s406_s27 }
  0x29   : > { %162 = vst [vmem:[%s153_s24] sm:$0xff] %v161_v10 }
  0x2a   : > { %v167_v13 = vadd.f32 0.531211, %v166_v11  ;;  %286 = vst [vmem:[%s153_s24 + $0x10] sm:$0xff] %v172_v12  ;;  %p408_p5 = pnand %p407_p4, %p539_p9  ;;  %p413_p10 = por %p412_p8, %p411_p7 }
  0x2c   : > { %285 = vst [vmem:[%s153_s24 + $0x8] sm:$0xff] %v167_v13  ;;  %p409_p6 = pneg %p408_p5 }
  0x2e   : > { %p414_p13 = pnand %p413_p10, %p409_p6 }
  0x30   : > { %417 = shalt.err (!%p414_p13)
}
  0x31   : > { %s476_s4 = smov 128   ;;  %s477_s5 = smov 8  }
  0x32   : > { %296 = dma.vmem_to_hbm [thread:$0]  (%p539_p9), %s190_s25, 384, %s192_s18, %s176_s9, %s476_s4, %s476_s4, %s477_s5  }
  0x33 PF: > { %s206_s12 = sand.u32 1, %s452_s6   ;;  %p303_p0 = pnand %p280_p12, %p546_p11 }
  0x34   : > { %s207_s13 = scalar_lea.sflag [#allocation4], %s206_s12 }
  0x35   : > { %p304_p1 = pneg %p303_p0 }
  0x37   : > { %447 = dma.done.wait (%p304_p1), %s207_s13, 384  }
  0x38   : > { %449 = vsyncadd (%p304_p1), %s207_s13, 4294966912  ;;  %s17_s11 = sadd.s32 1, %s472_s11   ;;  %s614_s6 = smov %s456_s7 }
  0x39   : > { %p14_p2 = scmp.ge.s32.totalorder %s17_s11, 4   ;;  %s615_s7 = smov %s460_s8 }
  0x3a   : > { %s616_s8 = smov %s544_s20  ;;  %s617_s9 = smov %s468_s10 }
  0x3b   : > { %s618_s10 = smov %s620_s14  ;;  %16 = sbr.rel (!%p14_p2) target bundleno = 6 (0x6), region = 73 }
  0x40   :  { %213 = vsyncpa [#allocation3], 1 }
  0x41   :  { %215 = vsyncpa [#allocation3 + $0x1], 1 }
  0x42   :  { %216 = vsyncpa [#allocation4], 1 }
  0x43   :  { %218 = vsyncpa [#allocation4 + $0x1], 1 }

</bundles_post_ra>
